<compile_context>
chip_gen: v7x
topology: tpu7x:2x2x1
jax: 0.10.0
libtpu: 0.0.40
codegen_flags: <defaults>
</compile_context>

<pallas_src>
import jax
import jax.numpy as jnp
from jax.experimental import pallas as pl
from jax.experimental.pallas import tpu as pltpu

HIDDEN1 = 512
HIDDEN2 = 256


def _round_up(n, m):
    return ((n + m - 1) // m) * m


def mlp_kernel(x_ref, w1_ref, b1_ref, w2_ref, b2_ref, w3_ref, b3_ref, o_ref):
    # fc1 + ReLU  (bf16 operands -> MXU, f32 accumulate, f32 epilogue)
    h1 = jnp.dot(x_ref[...], w1_ref[...], preferred_element_type=jnp.float32)
    h1 = jnp.maximum(h1 + b1_ref[...], 0.0).astype(jnp.bfloat16)
    # fc2 + ReLU
    h2 = jnp.dot(h1, w2_ref[...], preferred_element_type=jnp.float32)
    h2 = jnp.maximum(h2 + b2_ref[...], 0.0).astype(jnp.bfloat16)
    # fc3 (logits, no activation); output last dim is lane-padded to 128
    out = jnp.dot(h2, w3_ref[...], preferred_element_type=jnp.float32)
    o_ref[...] = (out + b3_ref[...]).astype(o_ref.dtype)


def simple_nn_forward(x, params, *, batch_tile=512):
    """x: (B, input_dim) f32.  params: (in, out) weights, (1, out) biases, f32."""
    B, D = x.shape
    w1, b1 = params["w1"], params["b1"]
    w2, b2 = params["w2"], params["b2"]
    w3, b3 = params["w3"], params["b3"]
    C = w3.shape[1]

    # Lane-pad the fc1 contraction dim and fc3 output dim to multiples of 128.
    Dp = _round_up(D, 128)
    Cp = _round_up(C, 128)

    # Batch tile: multiple of 8 sublanes, capped at `batch_tile` rows so a
    # large batch gives a long, pipelined (and megacore-shardable) grid.
    tb = _round_up(min(batch_tile, _round_up(B, 8)), 8)
    Bp = _round_up(B, tb)

    # Zero-padded, bf16-cast operands (padding contributes exact zeros).
    xp = jnp.zeros((Bp, Dp), jnp.bfloat16).at[:B, :D].set(x.astype(jnp.bfloat16))
    w1p = jnp.zeros((Dp, HIDDEN1), jnp.bfloat16).at[:D, :].set(w1.astype(jnp.bfloat16))
    w2b = w2.astype(jnp.bfloat16)
    w3p = jnp.zeros((HIDDEN2, Cp), jnp.bfloat16).at[:, :C].set(w3.astype(jnp.bfloat16))
    b3p = jnp.zeros((1, Cp), jnp.float32).at[:, :C].set(b3)

    grid = (Bp // tb,)

    def batch_map(i):
        return (i, 0)

    def full_map(i):
        return (0, 0)  # constant block index -> weights stay resident in VMEM

    out = pl.pallas_call(
        mlp_kernel,
        out_shape=jax.ShapeDtypeStruct((Bp, Cp), jnp.float32),
        grid_spec=pl.GridSpec(
            grid=grid,
            in_specs=[
                pl.BlockSpec((tb, Dp), batch_map),            # x tile
                pl.BlockSpec((Dp, HIDDEN1), full_map),        # w1
                pl.BlockSpec((1, HIDDEN1), full_map),         # b1
                pl.BlockSpec((HIDDEN1, HIDDEN2), full_map),   # w2
                pl.BlockSpec((1, HIDDEN2), full_map),         # b2
                pl.BlockSpec((HIDDEN2, Cp), full_map),        # w3 (lane-padded)
                pl.BlockSpec((1, Cp), full_map),              # b3 (lane-padded)
            ],
            out_specs=pl.BlockSpec((tb, Cp), batch_map),
        ),
        compiler_params=pltpu.CompilerParams(
            dimension_semantics=("parallel",),      # shard batch grid across TCs (v7x)
            vmem_limit_bytes=32 * 1024 * 1024,      # explicit budget; tiles fit easily
        ),
    )(xp, w1p, b1, w2b, b2, w3p, b3p)

    return out[:B, :C]


def init_params(key, input_dim, num_classes):
    """Deterministic init mirroring nn.Linear shapes, stored as (in, out)."""
    k1, k2, k3, k4, k5, k6 = jax.random.split(key, 6)

    def uniform(k, shape, fan_in):
        bound = 1.0 / jnp.sqrt(fan_in)
        return jax.random.uniform(k, shape, jnp.float32, -bound, bound)

    return {
        "w1": uniform(k1, (input_dim, HIDDEN1), input_dim),
        "b1": uniform(k2, (1, HIDDEN1), input_dim),
        "w2": uniform(k3, (HIDDEN1, HIDDEN2), HIDDEN1),
        "b2": uniform(k4, (1, HIDDEN2), HIDDEN1),
        "w3": uniform(k5, (HIDDEN2, num_classes), HIDDEN2),
        "b3": uniform(k6, (1, num_classes), HIDDEN2),
    }


def reference_forward(x, params):
    h1 = jnp.maximum(x @ params["w1"] + params["b1"], 0.0)
    h2 = jnp.maximum(h1 @ params["w2"] + params["b2"], 0.0)
    return h2 @ params["w3"] + params["b3"]


if __name__ == "__main__":
    key = jax.random.PRNGKey(0)
    kx, kp = jax.random.split(key)

    batch = 8
    input_dim = 32
    num_classes = 10

    x = jax.random.normal(kx, (batch, input_dim), jnp.float32)
    params = init_params(kp, input_dim, num_classes)

    fwd = jax.jit(lambda xx: simple_nn_forward(xx, params))
    out = jax.block_until_ready(fwd(x))

    ref = reference_forward(x, params)
    assert out.shape == (batch, num_classes), out.shape
    # bf16 matmul operands (f32 accumulation) -> compare against the f32
    # reference with a bf16-appropriate tolerance.
    assert jnp.allclose(out, ref, atol=5e-2, rtol=5e-2), \
        float(jnp.max(jnp.abs(out - ref)))

    print("KERNEL_OK")
</pallas_src>

<mosaic_0001>
module attributes {stable_mosaic.version = 11 : i64} {
  func.func @mlp_kernel(%arg0: i32, %arg1: memref<8x128xbf16, #tpu.memory_space<vmem>>, %arg2: memref<128x512xbf16, #tpu.memory_space<vmem>>, %arg3: memref<1x512xf32, #tpu.memory_space<vmem>>, %arg4: memref<512x256xbf16, #tpu.memory_space<vmem>>, %arg5: memref<1x256xf32, #tpu.memory_space<vmem>>, %arg6: memref<256x128xbf16, #tpu.memory_space<vmem>>, %arg7: memref<1x128xf32, #tpu.memory_space<vmem>>, %arg8: memref<8x128xf32, #tpu.memory_space<vmem>>) attributes {dimension_semantics = [#tpu.dimension_semantics<parallel>], iteration_bounds = array<i64: 1>, scalar_prefetch = 0 : i64, scratch_operands = 0 : i64, tpu.core_type = #tpu.core_type<tc>, window_params = [{transform_indices = @transform_0, window_bounds = array<i64: 8, 128>}, {pipeline_mode = #tpu.pipeline_mode<synchronous>, transform_indices = @transform_1, window_bounds = array<i64: 128, 512>}, {pipeline_mode = #tpu.pipeline_mode<synchronous>, transform_indices = @transform_2, window_bounds = array<i64: 1, 512>}, {pipeline_mode = #tpu.pipeline_mode<synchronous>, transform_indices = @transform_3, window_bounds = array<i64: 512, 256>}, {pipeline_mode = #tpu.pipeline_mode<synchronous>, transform_indices = @transform_4, window_bounds = array<i64: 1, 256>}, {pipeline_mode = #tpu.pipeline_mode<synchronous>, transform_indices = @transform_5, window_bounds = array<i64: 256, 128>}, {pipeline_mode = #tpu.pipeline_mode<synchronous>, transform_indices = @transform_6, window_bounds = array<i64: 1, 128>}, {transform_indices = @transform_7, window_bounds = array<i64: 8, 128>}]} {
    %c0 = arith.constant 0 : index
    %c0_0 = arith.constant 0 : index
    %0 = vector.load %arg1[%c0, %c0_0] : memref<8x128xbf16, #tpu.memory_space<vmem>>, vector<8x128xbf16>
    %c0_1 = arith.constant 0 : index
    %c0_2 = arith.constant 0 : index
    %1 = vector.load %arg2[%c0_1, %c0_2] : memref<128x512xbf16, #tpu.memory_space<vmem>>, vector<128x512xbf16>
    %cst = arith.constant dense<0.000000e+00> : vector<8x512xf32>
    %2 = tpu.matmul %0, %1, %cst {dimension_numbers = #tpu.dot_dimension_numbers<[1], [0], [0], [1], [0, 0, 1, 1], [], []>} : vector<8x128xbf16>, vector<128x512xbf16>, vector<8x512xf32> -> vector<8x512xf32>
    %c0_3 = arith.constant 0 : index
    %c0_4 = arith.constant 0 : index
    %3 = vector.load %arg3[%c0_3, %c0_4] : memref<1x512xf32, #tpu.memory_space<vmem>>, vector<1x512xf32>
    %4 = vector.broadcast %3 : vector<1x512xf32> to vector<8x512xf32>
    %5 = arith.addf %2, %4 : vector<8x512xf32>
    %cst_5 = arith.constant 0.000000e+00 : f32
    %6 = vector.broadcast %cst_5 : f32 to vector<8x512xf32>
    %7 = arith.maximumf %5, %6 : vector<8x512xf32>
    %8 = arith.truncf %7 : vector<8x512xf32> to vector<8x512xbf16>
    %c0_6 = arith.constant 0 : index
    %c0_7 = arith.constant 0 : index
    %9 = vector.load %arg4[%c0_6, %c0_7] : memref<512x256xbf16, #tpu.memory_space<vmem>>, vector<512x256xbf16>
    %cst_8 = arith.constant dense<0.000000e+00> : vector<8x256xf32>
    %10 = tpu.matmul %8, %9, %cst_8 {dimension_numbers = #tpu.dot_dimension_numbers<[1], [0], [0], [1], [0, 0, 1, 1], [], []>} : vector<8x512xbf16>, vector<512x256xbf16>, vector<8x256xf32> -> vector<8x256xf32>
    %c0_9 = arith.constant 0 : index
    %c0_10 = arith.constant 0 : index
    %11 = vector.load %arg5[%c0_9, %c0_10] : memref<1x256xf32, #tpu.memory_space<vmem>>, vector<1x256xf32>
    %12 = vector.broadcast %11 : vector<1x256xf32> to vector<8x256xf32>
    %13 = arith.addf %10, %12 : vector<8x256xf32>
    %cst_11 = arith.constant 0.000000e+00 : f32
    %14 = vector.broadcast %cst_11 : f32 to vector<8x256xf32>
    %15 = arith.maximumf %13, %14 : vector<8x256xf32>
    %16 = arith.truncf %15 : vector<8x256xf32> to vector<8x256xbf16>
    %c0_12 = arith.constant 0 : index
    %c0_13 = arith.constant 0 : index
    %17 = vector.load %arg6[%c0_12, %c0_13] : memref<256x128xbf16, #tpu.memory_space<vmem>>, vector<256x128xbf16>
    %cst_14 = arith.constant dense<0.000000e+00> : vector<8x128xf32>
    %18 = tpu.matmul %16, %17, %cst_14 {dimension_numbers = #tpu.dot_dimension_numbers<[1], [0], [0], [1], [0, 0, 1, 1], [], []>} : vector<8x256xbf16>, vector<256x128xbf16>, vector<8x128xf32> -> vector<8x128xf32>
    %c0_15 = arith.constant 0 : index
    %c0_16 = arith.constant 0 : index
    %19 = vector.load %arg7[%c0_15, %c0_16] : memref<1x128xf32, #tpu.memory_space<vmem>>, vector<1x128xf32>
    %20 = vector.broadcast %19 : vector<1x128xf32> to vector<8x128xf32>
    %21 = arith.addf %18, %20 : vector<8x128xf32>
    %c0_17 = arith.constant 0 : index
    %c0_18 = arith.constant 0 : index
    %22 = vector.load %arg8[%c0_17, %c0_18] : memref<8x128xf32, #tpu.memory_space<vmem>>, vector<8x128xf32>
    tpu.vector_store %arg8[%c0_17, %c0_18], %21 {strides = array<i32>} : memref<8x128xf32, #tpu.memory_space<vmem>>, vector<8x128xf32>,
    return
  }
  func.func @transform_0(%arg0: i32) -> (i32, i32) {
    %c0_i32 = arith.constant 0 : i32
    %c0_i32_0 = arith.constant 0 : i32
    return %arg0, %c0_i32 : i32, i32
  }
  func.func @transform_1(%arg0: i32) -> (i32, i32) {
    %c0_i32 = arith.constant 0 : i32
    %c0_i32_0 = arith.constant 0 : i32
    %c0_i32_1 = arith.constant 0 : i32
    return %c0_i32, %c0_i32_0 : i32, i32
  }
  func.func @transform_2(%arg0: i32) -> (i32, i32) {
    %c0_i32 = arith.constant 0 : i32
    %c0_i32_0 = arith.constant 0 : i32
    %c0_i32_1 = arith.constant 0 : i32
    return %c0_i32, %c0_i32_0 : i32, i32
  }
  func.func @transform_3(%arg0: i32) -> (i32, i32) {
    %c0_i32 = arith.constant 0 : i32
    %c0_i32_0 = arith.constant 0 : i32
    %c0_i32_1 = arith.constant 0 : i32
    return %c0_i32, %c0_i32_0 : i32, i32
  }
  func.func @transform_4(%arg0: i32) -> (i32, i32) {
    %c0_i32 = arith.constant 0 : i32
    %c0_i32_0 = arith.constant 0 : i32
    %c0_i32_1 = arith.constant 0 : i32
    return %c0_i32, %c0_i32_0 : i32, i32
  }
  func.func @transform_5(%arg0: i32) -> (i32, i32) {
    %c0_i32 = arith.constant 0 : i32
    %c0_i32_0 = arith.constant 0 : i32
    %c0_i32_1 = arith.constant 0 : i32
    return %c0_i32, %c0_i32_0 : i32, i32
  }
  func.func @transform_6(%arg0: i32) -> (i32, i32) {
    %c0_i32 = arith.constant 0 : i32
    %c0_i32_0 = arith.constant 0 : i32
    %c0_i32_1 = arith.constant 0 : i32
    return %c0_i32, %c0_i32_0 : i32, i32
  }
  func.func @transform_7(%arg0: i32) -> (i32, i32) {
    %c0_i32 = arith.constant 0 : i32
    %c0_i32_0 = arith.constant 0 : i32
    return %arg0, %c0_i32 : i32, i32
  }
}

</mosaic_0001>

<bundles_post_ra>
// kernel: _lambda_.1
= control target key start
LH: loop header
LB: loop body
LE: loop exit
PB: predicated region body
PF: predicated region fallthrough
CT: control target
= control target key end

     0   :  { %v1332_v2 = vmov 0   ;;  %s1758_s0 = inlined_call_operand.vmem [shape: bf16[8,128], index: 0, kind: input, shape index: {}]   ;;  %s1759_s1 = inlined_call_operand.vmem [shape: bf16[128,512], index: 1, kind: input, shape index: {}]   ;;  %s1760_s2 = inlined_call_operand.vmem [shape: f32[1,512], index: 2, kind: input, shape index: {}]   ;;  %s1761_s3 = inlined_call_operand.vmem [shape: bf16[512,256], index: 3, kind: input, shape index: {}]   ;;  %s1762_s4 = inlined_call_operand.vmem [shape: f32[1,256], index: 4, kind: input, shape index: {}]   ;;  %s1763_s5 = inlined_call_operand.vmem [shape: bf16[256,128], index: 5, kind: input, shape index: {}]   ;;  %s1764_s6 = inlined_call_operand.vmem [shape: f32[1,128], index: 6, kind: input, shape index: {}]   ;;  %s1765_s7 = inlined_call_operand.hbm [shape: f32[8,128], index: 7, kind: output, shape index: {}]  }
   0x1   :  { %v1148_v0 = vld [vmem:[%s1759_s1 + $0x4] ss:$16 sps:$4 sm:$0xff]   ;;  %v1150_v1 = vld [vmem:[%s1759_s1] ss:$16 sps:$4 sm:$0xff]   ;;  %275 = vmatprep.mubr.bf16.mxu1 %v1332_v2  ;;  %v1174_v22 = vld [vmem:[%s1759_s1 + $0xc] ss:$16 sps:$4 sm:$0xff]  }
   0x2   :  { %243 = vmatprep.subr.bf16.mxu1 %v1148_v0  ;;  %v1151_v3 = vld [vmem:[%s1759_s1 + $0x24] ss:$16 sps:$4 sm:$0xff]   ;;  %v1153_v4 = vld [vmem:[%s1759_s1 + $0x20] ss:$16 sps:$4 sm:$0xff]   ;;  %v1172_v26 = vld [vmem:[%s1759_s1 + $0x8] ss:$16 sps:$4 sm:$0xff]  }
   0x3   :  { %244 = vmatpush1.bf16.msra.mxu1 %v1150_v1  ;;  %v1154_v5 = vld [vmem:[%s1759_s1 + $0x44] ss:$16 sps:$4 sm:$0xff]   ;;  %v1156_v6 = vld [vmem:[%s1759_s1 + $0x40] ss:$16 sps:$4 sm:$0xff]   ;;  %v1177_v27 = vld [vmem:[%s1759_s1 + $0x2c] ss:$16 sps:$4 sm:$0xff]  }
   0x4   :  { %245 = vmatprep.subr.bf16.mxu1 %v1151_v3  ;;  %v1157_v7 = vld [vmem:[%s1759_s1 + $0x64] ss:$16 sps:$4 sm:$0xff]   ;;  %v1159_v8 = vld [vmem:[%s1759_s1 + $0x60] ss:$16 sps:$4 sm:$0xff]   ;;  %v1175_v30 = vld [vmem:[%s1759_s1 + $0x28] ss:$16 sps:$4 sm:$0xff]  }
   0x5   :  { %v1160_v9 = vld [vmem:[%s1759_s1 + $0x84] ss:$16 sps:$4 sm:$0xff]   ;;  %v1162_v10 = vld [vmem:[%s1759_s1 + $0x80] ss:$16 sps:$4 sm:$0xff]   ;;  %v1180_v31 = vld [vmem:[%s1759_s1 + $0x4c] ss:$16 sps:$4 sm:$0xff]  }
   0x6   :  { %v1163_v11 = vld [vmem:[%s1759_s1 + $0xa4] ss:$16 sps:$4 sm:$0xff]   ;;  %v1165_v12 = vld [vmem:[%s1759_s1 + $0xa0] ss:$16 sps:$4 sm:$0xff]   ;;  %v1178_v33 = vld [vmem:[%s1759_s1 + $0x48] ss:$16 sps:$4 sm:$0xff]  }
   0x7   :  { %246 = vmatpush1.bf16.msra.mxu1 %v1153_v4  ;;  %v1166_v13 = vld [vmem:[%s1759_s1 + $0xc4] ss:$16 sps:$4 sm:$0xff]   ;;  %v1168_v14 = vld [vmem:[%s1759_s1 + $0xc0] ss:$16 sps:$4 sm:$0xff]   ;;  %v1183_v35 = vld [vmem:[%s1759_s1 + $0x6c] ss:$16 sps:$4 sm:$0xff]  }
   0x8   :  { %247 = vmatprep.subr.bf16.mxu1 %v1154_v5  ;;  %v1196_v15 = vld [vmem:[%s1761_s3 + $0x4] ss:$8 sps:$4 sm:$0xff]   ;;  %v1198_v16 = vld [vmem:[%s1761_s3] ss:$8 sps:$4 sm:$0xff]   ;;  %v1199_v17 = vld [vmem:[%s1761_s3 + $0x14] ss:$8 sps:$4 sm:$0xff]  }
   0x9   :  { %v1169_v18 = vld [vmem:[%s1759_s1 + $0xe4] ss:$16 sps:$4 sm:$0xff]   ;;  %729 = vmatprep.subr.bf16.mxu0 %v1196_v15  ;;  %v1201_v19 = vld [vmem:[%s1761_s3 + $0x10] ss:$8 sps:$4 sm:$0xff]   ;;  %v1204_v23 = vld [vmem:[%s1761_s3 + $0x20] ss:$8 sps:$4 sm:$0xff]  }
   0xa   :  { %730 = vmatpush1.bf16.msra.mxu0 %v1198_v16  ;;  %v1202_v20 = vld [vmem:[%s1761_s3 + $0x24] ss:$8 sps:$4 sm:$0xff]   ;;  %v1171_v21 = vld [vmem:[%s1759_s1 + $0xe0] ss:$16 sps:$4 sm:$0xff]   ;;  %v1205_v25 = vld [vmem:[%s1761_s3 + $0x34] ss:$8 sps:$4 sm:$0xff]  }
   0xb   :  { %248 = vmatpush1.bf16.msra.mxu1 %v1156_v6  ;;  %731 = vmatprep.subr.bf16.mxu0 %v1199_v17  ;;  %v1446_v24 = vld [vmem:[%s1758_s0] sm:$0xf]  ;;  %v1207_v28 = vld [vmem:[%s1761_s3 + $0x30] ss:$8 sps:$4 sm:$0xff]   ;;  %v1208_v29 = vld [vmem:[%s1761_s3 + $0x44] ss:$8 sps:$4 sm:$0xff]  }
   0xc   :  { %249 = vmatprep.subr.bf16.mxu1 %v1157_v7  ;;  %v1210_v32 = vld [vmem:[%s1761_s3 + $0x40] ss:$8 sps:$4 sm:$0xff]   ;;  %v1211_v34 = vld [vmem:[%s1761_s3 + $0x54] ss:$8 sps:$4 sm:$0xff]   ;;  %v1213_v36 = vld [vmem:[%s1761_s3 + $0x50] ss:$8 sps:$4 sm:$0xff]  }
   0xd   :  { %v1214_v37 = vld [vmem:[%s1761_s3 + $0x64] ss:$8 sps:$4 sm:$0xff]   ;;  %v1181_v38 = vld [vmem:[%s1759_s1 + $0x68] ss:$16 sps:$4 sm:$0xff]   ;;  %v1217_v41 = vld [vmem:[%s1761_s3 + $0x74] ss:$8 sps:$4 sm:$0xff]  }
   0xe   :  { %732 = vmatpush1.bf16.msra.mxu0 %v1201_v19  ;;  %v1186_v39 = vld [vmem:[%s1759_s1 + $0x8c] ss:$16 sps:$4 sm:$0xff]   ;;  %v1216_v40 = vld [vmem:[%s1761_s3 + $0x60] ss:$8 sps:$4 sm:$0xff]   ;;  %v1219_v44 = vld [vmem:[%s1761_s3 + $0x70] ss:$8 sps:$4 sm:$0xff]  }
   0xf   :  { %250 = vmatpush1.bf16.msra.mxu1 %v1159_v8  ;;  %733 = vmatprep.subr.bf16.mxu0 %v1202_v20  ;;  %v1184_v42 = vld [vmem:[%s1759_s1 + $0x88] ss:$16 sps:$4 sm:$0xff]   ;;  %v1189_v43 = vld [vmem:[%s1759_s1 + $0xac] ss:$16 sps:$4 sm:$0xff]  }
  0x10   :  { %251 = vmatprep.subr.bf16.mxu1 %v1160_v9  ;;  %v1220_v45 = vld [vmem:[%s1761_s3 + $0x84] ss:$8 sps:$4 sm:$0xff]   ;;  %v1187_v46 = vld [vmem:[%s1759_s1 + $0xa8] ss:$16 sps:$4 sm:$0xff]   ;;  %v1223_v49 = vld [vmem:[%s1761_s3 + $0x94] ss:$8 sps:$4 sm:$0xff]  }
  0x11   :  { %v1192_v47 = vld [vmem:[%s1759_s1 + $0xcc] ss:$16 sps:$4 sm:$0xff]   ;;  %v1222_v48 = vld [vmem:[%s1761_s3 + $0x80] ss:$8 sps:$4 sm:$0xff]   ;;  %v1225_v52 = vld [vmem:[%s1761_s3 + $0x90] ss:$8 sps:$4 sm:$0xff]  }
  0x12   :  { %734 = vmatpush1.bf16.msra.mxu0 %v1204_v23  ;;  %v1190_v50 = vld [vmem:[%s1759_s1 + $0xc8] ss:$16 sps:$4 sm:$0xff]   ;;  %v1195_v51 = vld [vmem:[%s1759_s1 + $0xec] ss:$16 sps:$4 sm:$0xff]  }
  0x13   :  { %252 = vmatpush1.bf16.msra.mxu1 %v1162_v10  ;;  %735 = vmatprep.subr.bf16.mxu0 %v1205_v25  ;;  %v1226_v53 = vld [vmem:[%s1761_s3 + $0xa4] ss:$8 sps:$4 sm:$0xff]   ;;  %v1193_v54 = vld [vmem:[%s1759_s1 + $0xe8] ss:$16 sps:$4 sm:$0xff]   ;;  %v1229_v56 = vld [vmem:[%s1761_s3 + $0xb4] ss:$8 sps:$4 sm:$0xff]  }
  0x14   :  { %253 = vmatprep.subr.bf16.mxu1 %v1163_v11  ;;  %v1228_v55 = vld [vmem:[%s1761_s3 + $0xa0] ss:$8 sps:$4 sm:$0xff]  }
  0x16   :  { %736 = vmatpush1.bf16.msra.mxu0 %v1207_v28 }
  0x17   :  { %254 = vmatpush1.bf16.msra.mxu1 %v1165_v12  ;;  %737 = vmatprep.subr.bf16.mxu0 %v1208_v29 }
  0x18   :  { %255 = vmatprep.subr.bf16.mxu1 %v1166_v13 }
  0x1a   :  { %738 = vmatpush1.bf16.msra.mxu0 %v1210_v32 }
  0x1b   :  { %256 = vmatpush1.bf16.msra.mxu1 %v1168_v14  ;;  %739 = vmatprep.subr.bf16.mxu0 %v1211_v34 }
  0x1c   :  { %257 = vmatprep.subr.bf16.mxu1 %v1169_v18 }
  0x1e   :  { %740 = vmatpush1.bf16.msra.mxu0 %v1213_v36 }
  0x1f   :  { %258 = vmatpush1.bf16.msra.mxu1 %v1171_v21  ;;  %741 = vmatprep.subr.bf16.mxu0 %v1214_v37 }
  0x20   :  { %284 = vmatprep.subr.bf16.mxu1 %v1174_v22 }
  0x22   :  { %276 = vmatmul.mubr.bf16.vlgmr.msra.gmra.mrb[0].mxu1 %v1446_v24  ;;  %742 = vmatpush1.bf16.msra.mxu0 %v1216_v40 }
  0x23   :  { %285 = vmatpush1.bf16.msra.mxu1 %v1172_v26  ;;  %316 = vmatprep.mubr.bf16.mxu1 %v1332_v2 }
  0x24   :  { %286 = vmatprep.subr.bf16.mxu1 %v1177_v27  ;;  %743 = vmatprep.subr.bf16.mxu0 %v1217_v41 }
  0x26   :  { %744 = vmatpush1.bf16.msra.mxu0 %v1219_v44 }
  0x27   :  { %287 = vmatpush1.bf16.msra.mxu1 %v1175_v30  ;;  %745 = vmatprep.subr.bf16.mxu0 %v1220_v45 }
  0x28   :  { %288 = vmatprep.subr.bf16.mxu1 %v1180_v31 }
  0x2a   :  { %746 = vmatpush1.bf16.msra.mxu0 %v1222_v48 }
  0x2b   :  { %289 = vmatpush1.bf16.msra.mxu1 %v1178_v33  ;;  %747 = vmatprep.subr.bf16.mxu0 %v1223_v49 }
  0x2c   :  { %290 = vmatprep.subr.bf16.mxu1 %v1183_v35 }
  0x2e   :  { %748 = vmatpush1.bf16.msra.mxu0 %v1225_v52 }
  0x2f   :  { %291 = vmatpush1.bf16.msra.mxu1 %v1181_v38  ;;  %749 = vmatprep.subr.bf16.mxu0 %v1226_v53 }
  0x30   :  { %292 = vmatprep.subr.bf16.mxu1 %v1186_v39 }
  0x33   :  { %293 = vmatpush1.bf16.msra.mxu1 %v1184_v42 }
  0x34   :  { %294 = vmatprep.subr.bf16.mxu1 %v1189_v43 }
  0x37   :  { %295 = vmatpush1.bf16.msra.mxu1 %v1187_v46 }
  0x38   :  { %296 = vmatprep.subr.bf16.mxu1 %v1192_v47 }
  0x3b   :  { %297 = vmatpush1.bf16.msra.mxu1 %v1190_v50 }
  0x3c   :  { %298 = vmatprep.subr.bf16.mxu1 %v1195_v51 }
  0x3f   :  { %299 = vmatpush1.bf16.msra.mxu1 %v1193_v54 }
  0x40   :  { %12 = vsyncpa [#allocation3], 0  ;;  %750 = vmatpush1.bf16.msra.mxu0 %v1228_v55  ;;  %v1231_v57 = vld [vmem:[%s1761_s3 + $0xb0] ss:$8 sps:$4 sm:$0xff]   ;;  %v1232_v58 = vld [vmem:[%s1761_s3 + $0xc4] ss:$8 sps:$4 sm:$0xff]   ;;  %v63_v15 = vlaneseq }
  0x41   :  { %751 = vmatprep.subr.bf16.mxu0 %v1229_v56  ;;  %v1234_v59 = vld [vmem:[%s1761_s3 + $0xc0] ss:$8 sps:$4 sm:$0xff]   ;;  %v1235_v60 = vld [vmem:[%s1761_s3 + $0xd4] ss:$8 sps:$4 sm:$0xff]   ;;  %v1237_v61 = vld [vmem:[%s1761_s3 + $0xd0] ss:$8 sps:$4 sm:$0xff]  }
  0x42   :  { %317 = vmatmul.mubr.bf16.vlgmr.msra.gmra.mrb[4].mxu1 %v1446_v24  ;;  %v1238_v62 = vld [vmem:[%s1761_s3 + $0xe4] ss:$8 sps:$4 sm:$0xff]   ;;  %v1240_v63 = vld [vmem:[%s1761_s3 + $0xe0] ss:$8 sps:$4 sm:$0xff]   ;;  %v1241_v0 = vld [vmem:[%s1761_s3 + $0xf4] ss:$8 sps:$4 sm:$0xff]  }
  0x43   :  { %v1243_v1 = vld [vmem:[%s1761_s3 + $0xf0] ss:$8 sps:$4 sm:$0xff]   ;;  %v1246_v2 = vld [vmem:[%s1761_s3 + $0x104] ss:$8 sps:$4 sm:$0xff]   ;;  %v1612_v16 = vshrl.u32 %v63_v15, 7  ;;  %s1333_s8 = smov [#allocation2]  }
  0x44   :  { %752 = vmatpush1.bf16.msra.mxu0 %v1231_v57  ;;  %v1292_v3 = vld [vmem:[%s1763_s5 + $0x40] sm:$0xff]   ;;  %v1294_v5 = vld [vmem:[%s1763_s5 + $0x48] sm:$0xff]   ;;  %v1296_v7 = vld [vmem:[%s1763_s5 + $0x50] sm:$0xff]   ;;  %s997_s9 = sshll.u32 %s1333_s8, 4  ;;  %s998_s9 = int_to_ptr.vmem [resolvable:$true] %s997_s9 }
  0x45   :  { %753 = vmatprep.subr.bf16.mxu0 %v1232_v58  ;;  %v1293_v4 = vld [vmem:[%s1763_s5] sm:$0xff]   ;;  %1118 = vmatprep.subr.bf16.mxu1 %v1292_v3  ;;  %v1295_v6 = vld [vmem:[%s1763_s5 + $0x8] sm:$0xff]   ;;  %v1297_v8 = vld [vmem:[%s1763_s5 + $0x10] sm:$0xff]   ;;  %v65_v17 = vsub.s32 0, %v1612_v16  ;;  %v69_v19 = vsub.s32 1, %v1612_v16  ;;  %v77_v43 = vsub.s32 3, %v1612_v16  ;;  %p1313_p1 = scmp.lt.s32.totalorder %s998_s9, %s998_s9 }
  0x46   :  { %1119 = vmatpush3.bf16.msra.mxu1 %v1293_v4  ;;  %v1298_v9 = vld [vmem:[%s1763_s5 + $0x58] sm:$0xff]   ;;  %v1300_v11 = vld [vmem:[%s1763_s5 + $0x60] sm:$0xff]   ;;  %v1302_v13 = vld [vmem:[%s1763_s5 + $0x68] sm:$0xff]   ;;  %s1308_s10 = scalar_lea.vmem %s998_s9, 128 }
  0x47   :  { %1120 = vmatprep.subr.bf16.mxu1 %v1294_v5  ;;  %v1299_v10 = vld [vmem:[%s1763_s5 + $0x18] sm:$0xff]   ;;  %v1301_v12 = vld [vmem:[%s1763_s5 + $0x20] sm:$0xff]   ;;  %v1303_v14 = vld [vmem:[%s1763_s5 + $0x28] sm:$0xff]   ;;  %p1309_p0 = scmp.ne.s32.totalorder %s998_s9, %s1308_s10  ;;  %p1314_p2 = scmp.lt.s32.totalorder %s1308_s10, %s1308_s10 }
  0x48   :  { %754 = vmatpush1.bf16.msra.mxu0 %v1234_v59  ;;  %v1618_v18 = vld [vmem:[%s1760_s2] sm:$0xf]  ;;  %v1249_v33 = vld [vmem:[%s1761_s3 + $0x114] ss:$8 sps:$4 sm:$0xff]   ;;  %v1247_v34 = vld [vmem:[%s1761_s3 + $0x110] ss:$8 sps:$4 sm:$0xff]  }
  0x49   :  { %755 = vmatprep.subr.bf16.mxu0 %v1235_v60  ;;  %v66_v20 = vrot.slane %v1618_v18, %v65_v17  ;;  %v70_v21 = vrot.slane %v1618_v18, %v69_v19  ;;  %v1244_v31 = vld [vmem:[%s1761_s3 + $0x100] ss:$8 sps:$4 sm:$0xff]   ;;  %v1252_v35 = vld [vmem:[%s1761_s3 + $0x124] ss:$8 sps:$4 sm:$0xff]   ;;  %v1255_v37 = vld [vmem:[%s1761_s3 + $0x134] ss:$8 sps:$4 sm:$0xff]   ;;  %v78_v46 = vrot.slane %v1618_v18, %v77_v43  ;;  %p1315_p3 = por %p1314_p2, %p1313_p1 }
  0x4a   :  { %1121 = vmatpush3.bf16.msra.mxu1 %v1295_v6  ;;  %v1250_v36 = vld [vmem:[%s1761_s3 + $0x120] ss:$8 sps:$4 sm:$0xff]   ;;  %v1253_v38 = vld [vmem:[%s1761_s3 + $0x130] ss:$8 sps:$4 sm:$0xff]   ;;  %v1258_v39 = vld [vmem:[%s1761_s3 + $0x144] ss:$8 sps:$4 sm:$0xff]  }
  0x4b   :  { %1122 = vmatprep.subr.bf16.mxu1 %v1296_v7  ;;  %v1256_v40 = vld [vmem:[%s1761_s3 + $0x140] ss:$8 sps:$4 sm:$0xff]   ;;  %v1261_v41 = vld [vmem:[%s1761_s3 + $0x154] ss:$8 sps:$4 sm:$0xff]   ;;  %v1259_v42 = vld [vmem:[%s1761_s3 + $0x150] ss:$8 sps:$4 sm:$0xff]   ;;  %p1316_p4 = pnand %p1315_p3, %p1309_p0 }
  0x4c   :  { %756 = vmatpush1.bf16.msra.mxu0 %v1237_v61  ;;  %v1264_v44 = vld [vmem:[%s1761_s3 + $0x164] ss:$8 sps:$4 sm:$0xff]   ;;  %v1262_v45 = vld [vmem:[%s1761_s3 + $0x160] ss:$8 sps:$4 sm:$0xff]   ;;  %v1267_v47 = vld [vmem:[%s1761_s3 + $0x174] ss:$8 sps:$4 sm:$0xff]  }
  0x4d   :  { %757 = vmatprep.subr.bf16.mxu0 %v1238_v62  ;;  %v1265_v50 = vld [vmem:[%s1761_s3 + $0x170] ss:$8 sps:$4 sm:$0xff]   ;;  %v1270_v53 = vld [vmem:[%s1761_s3 + $0x184] ss:$8 sps:$4 sm:$0xff]   ;;  %v1268_v56 = vld [vmem:[%s1761_s3 + $0x180] ss:$8 sps:$4 sm:$0xff]  }
  0x4e   :  { %1123 = vmatpush3.bf16.msra.mxu1 %v1297_v8  ;;  %v1273_v58 = vld [vmem:[%s1761_s3 + $0x194] ss:$8 sps:$4 sm:$0xff]   ;;  %v1271_v59 = vld [vmem:[%s1761_s3 + $0x190] ss:$8 sps:$4 sm:$0xff]   ;;  %v1276_v60 = vld [vmem:[%s1761_s3 + $0x1a4] ss:$8 sps:$4 sm:$0xff]  }
  0x4f   :  { %1124 = vmatprep.subr.bf16.mxu1 %v1298_v9  ;;  %v1274_v61 = vld [vmem:[%s1761_s3 + $0x1a0] ss:$8 sps:$4 sm:$0xff]   ;;  %v1279_v62 = vld [vmem:[%s1761_s3 + $0x1b4] ss:$8 sps:$4 sm:$0xff]   ;;  %v1283_v4 = vld [vmem:[%s1761_s3 + $0x1d0] ss:$8 sps:$4 sm:$0xff]  }
  0x50   :  { %758 = vmatpush1.bf16.msra.mxu0 %v1240_v63  ;;  %v1277_v63 = vld [vmem:[%s1761_s3 + $0x1b0] ss:$8 sps:$4 sm:$0xff]   ;;  %v1285_v3 = vld [vmem:[%s1761_s3 + $0x1d4] ss:$8 sps:$4 sm:$0xff]   ;;  %v1288_v6 = vld [vmem:[%s1761_s3 + $0x1e4] ss:$8 sps:$4 sm:$0xff]  }
  0x51   :  { %759 = vmatprep.subr.bf16.mxu0 %v1241_v0  ;;  %v1282_v0 = vld [vmem:[%s1761_s3 + $0x1c4] ss:$8 sps:$4 sm:$0xff]   ;;  %v1286_v7 = vld [vmem:[%s1761_s3 + $0x1e0] ss:$8 sps:$4 sm:$0xff]   ;;  %v1291_v9 = vld [vmem:[%s1761_s3 + $0x1f4] ss:$8 sps:$4 sm:$0xff]  }
  0x52   :  { %1125 = vmatpush3.bf16.msra.mxu1 %v1299_v10  ;;  %v1289_v10 = vld [vmem:[%s1761_s3 + $0x1f0] ss:$8 sps:$4 sm:$0xff]  }
  0x53   :  { %1126 = vmatprep.subr.bf16.mxu1 %v1300_v11  ;;  %v1306_v15 = vld [vmem:[%s1763_s5 + $0x78] sm:$0xff]  }
  0x54   :  { %760 = vmatpush1.bf16.msra.mxu0 %v1243_v1  ;;  %v1280_v1 = vld [vmem:[%s1761_s3 + $0x1c0] ss:$8 sps:$4 sm:$0xff]  }
  0x55   :  { %770 = vmatprep.subr.bf16.mxu0 %v1246_v2  ;;  %v73_v2 = vsub.s32 2, %v1612_v16 }
  0x56   :  { %1127 = vmatpush3.bf16.msra.mxu1 %v1301_v12 }
  0x57   :  { %1128 = vmatprep.subr.bf16.mxu1 %v1302_v13  ;;  %v74_v5 = vrot.slane %v1618_v18, %v73_v2  ;;  %v1304_v13 = vld [vmem:[%s1763_s5 + $0x70] sm:$0xff]   ;;  %v1307_v18 = vld [vmem:[%s1763_s5 + $0x38] sm:$0xff]  }
  0x5a   :  { %1129 = vmatpush3.bf16.msra.mxu1 %v1303_v14  ;;  %v1305_v14 = vld [vmem:[%s1763_s5 + $0x30] sm:$0xff]  }
  0x5b   :  { %1130 = vmatprep.subr.bf16.mxu1 %v1304_v13 }
  0x5e   :  { %1131 = vmatpush3.bf16.msra.mxu1 %v1305_v14 }
  0x5f   :  { %1132 = vmatprep.subr.bf16.mxu1 %v1306_v15 }
  0x62   :  { %1133 = vmatpush3.bf16.msra.mxu1 %v1307_v18 }
  0xf5   :  { %v277_v22 = vpop.f32.mrb[0].mxu1 }
  0xf6   :  { %v278_v23 = vadd.f32 %v277_v22, %v66_v20  ;;  %v279_v24 = vpop.f32.mrb[1].mxu1  ;;  %v397_v20 = vld [vmem:[%s1762_s4] sm:$0x3] }
  0xf7   :  { %v280_v25 = vadd.f32 %v279_v24, %v70_v21  ;;  %v281_v26 = vpop.f32.mrb[2].mxu1  ;;  %v402_v21 = vrot.slane %v397_v20, %v65_v17  ;;  %v406_v22 = vrot.slane %v397_v20, %v69_v19  ;;  %v1101_v17 = vld [vmem:[%s1764_s6] ss:$0 sm:$0xff] }
  0xf8   :  { %v325_v27 = vmax.f32 %v278_v23, 0.0  ;;  %v282_v28 = vpop.f32.mrb[3].mxu1 }
  0xf9   :  { %v326_v29 = vmax.f32 %v280_v25, 0.0 }
  0xfa   :  { %v329_v32 = vpack.c.bf16 %v325_v27, %v325_v27 }
  0xfb   :  { %v330_v30 = vpack.c.bf16 %v326_v29, %v326_v29 }
  0xfd   :  { %761 = vmatprep.mubr.bf16.mxu0 %v330_v30 }
  0xfe   :  { %762 = vmatmul.mubr.bf16.vlgmr.msra.gmra.mrb[0].mxu0 %v329_v32 }
  0xff   :  { %771 = vmatpush1.bf16.msra.mxu0 %v1244_v31 }
 0x100   :  { %772 = vmatprep.subr.bf16.mxu0 %v1249_v33 }
 0x103   :  { %773 = vmatpush1.bf16.msra.mxu0 %v1247_v34 }
 0x104   :  { %774 = vmatprep.subr.bf16.mxu0 %v1252_v35 }
 0x107   :  { %775 = vmatpush1.bf16.msra.mxu0 %v1250_v36 }
 0x108   :  { %776 = vmatprep.subr.bf16.mxu0 %v1255_v37 }
 0x10b   :  { %777 = vmatpush1.bf16.msra.mxu0 %v1253_v38 }
 0x10c   :  { %778 = vmatprep.subr.bf16.mxu0 %v1258_v39 }
 0x10f   :  { %779 = vmatpush1.bf16.msra.mxu0 %v1256_v40 }
 0x110   :  { %780 = vmatprep.subr.bf16.mxu0 %v1261_v41 }
 0x113   :  { %781 = vmatpush1.bf16.msra.mxu0 %v1259_v42 }
 0x114   :  { %782 = vmatprep.subr.bf16.mxu0 %v1264_v44 }
 0x115   :  { %v318_v48 = vpop.f32.mrb[4].mxu1 }
 0x116   :  { %v320_v49 = vpop.f32.mrb[5].mxu1  ;;  %v319_v8 = vadd.f32 %v318_v48, %v74_v5 }
 0x117   :  { %783 = vmatpush1.bf16.msra.mxu0 %v1262_v45  ;;  %v321_v51 = vadd.f32 %v320_v49, %v78_v46  ;;  %v322_v52 = vpop.f32.mrb[6].mxu1 }
 0x118   :  { %784 = vmatprep.subr.bf16.mxu0 %v1267_v47  ;;  %v323_v54 = vpop.f32.mrb[7].mxu1  ;;  %v327_v11 = vmax.f32 %v319_v8, 0.0 }
 0x119   :  { %v328_v55 = vmax.f32 %v321_v51, 0.0 }
 0x11a   :  { %v331_v12 = vpack.c.bf16 %v327_v11, %v327_v11 }
 0x11b   :  { %785 = vmatpush1.bf16.msra.mxu0 %v1265_v50  ;;  %v332_v57 = vpack.c.bf16 %v328_v55, %v328_v55 }
 0x11c   :  { %786 = vmatprep.subr.bf16.mxu0 %v1270_v53 }
 0x11d   :  { %802 = vmatprep.mubr.bf16.mxu0 %v332_v57 }
 0x11f   :  { %787 = vmatpush1.bf16.msra.mxu0 %v1268_v56 }
 0x120   :  { %788 = vmatprep.subr.bf16.mxu0 %v1273_v58 }
 0x123   :  { %789 = vmatpush1.bf16.msra.mxu0 %v1271_v59 }
 0x124   :  { %790 = vmatprep.subr.bf16.mxu0 %v1276_v60 }
 0x127   :  { %791 = vmatpush1.bf16.msra.mxu0 %v1274_v61 }
 0x128   :  { %792 = vmatprep.subr.bf16.mxu0 %v1279_v62 }
 0x12b   :  { %793 = vmatpush1.bf16.msra.mxu0 %v1277_v63 }
 0x12c   :  { %794 = vmatprep.subr.bf16.mxu0 %v1282_v0 }
 0x12f   :  { %795 = vmatpush1.bf16.msra.mxu0 %v1280_v1 }
 0x130   :  { %796 = vmatprep.subr.bf16.mxu0 %v1285_v3 }
 0x133   :  { %797 = vmatpush1.bf16.msra.mxu0 %v1283_v4 }
 0x134   :  { %798 = vmatprep.subr.bf16.mxu0 %v1288_v6 }
 0x137   :  { %799 = vmatpush1.bf16.msra.mxu0 %v1286_v7 }
 0x138   :  { %800 = vmatprep.subr.bf16.mxu0 %v1291_v9 }
 0x13b   :  { %801 = vmatpush1.bf16.msra.mxu0 %v1289_v10 }
 0x13e   :  { %803 = vmatmul.mubr.bf16.vlgmr.msra.gmra.mrb[0].mxu0 %v331_v12 }
 0x211   :  { %v804_v23 = vpop.f32.mrb[0].mxu0 }
 0x212   :  { %v1140_v24 = vadd.f32 %v804_v23, %v402_v21  ;;  %v806_v25 = vpop.f32.mrb[1].mxu0 }
 0x213   :  { %v1141_v26 = vadd.f32 %v806_v25, %v406_v22  ;;  %v808_v27 = vpop.f32.mrb[2].mxu0 }
 0x214   :  { %v811_v28 = vmax.f32 %v1140_v24, 0.0  ;;  %v809_v29 = vpop.f32.mrb[3].mxu0 }
 0x215   :  { %v812_v30 = vmax.f32 %v1141_v26, 0.0 }
 0x216   :  { %v813_v32 = vpack.c.bf16 %v811_v28, %v811_v28 }
 0x217   :  { %v814_v31 = vpack.c.bf16 %v812_v30, %v812_v30 }
 0x219   :  { %982 = vmatprep.mubr.bf16.mxu1 %v814_v31 }
 0x21a   :  { %983 = vmatmul.mubr.bf16.vlgmr.msra.gmra.mrb[8].mxu1 %v813_v32 }
 0x2ed   :  { %v1134_v33 = vpop.f32.mrb[8].mxu1 }
 0x2ee   :  { %v1135_v34 = vpop.f32.mrb[9].mxu1 }
 0x2ef   :  { %v1136_v16 = vadd.f32 %v1135_v34, %v1134_v33  ;;  %v1137_v19 = vpop.f32.mrb[10].mxu1 }
 0x2f0   :  { %v1138_v35 = vpop.f32.mrb[11].mxu1 }
 0x2f1   :  { %v985_v36 = vadd.f32 %v1136_v16, %v1101_v17 }
 0x2f3   :  { %990 = vst [vmem:[#allocation2] sm:$0xff] %v985_v36 }
 0x2f4   :  { %1319 = shalt.err (!%p1316_p4)
}
 0x2f5   :  { %s1320_s12 = scalar_lea.hbm %s1765_s7, 128 }
 0x2f6   :  { %p1321_p5 = scmp.ne.s32.totalorder %s1765_s7, %s1320_s12  ;;  %p1324_p6 = scmp.lt.u32.totalorder %s1320_s12, %s1765_s7 }
 0x2f8   :  { %p1326_p7 = pnand %p1324_p6, %p1321_p5 }
 0x2fa   :  { %1329 = shalt.err (!%p1326_p7)
}
 0x2fb   :  { %1000 = dma.vmem_to_hbm [thread:$0]  %s998_s9, 128, %s1765_s7, [#allocation3]  }
 0x2fc   :  { %1330 = dma.done.wait [#allocation3], 128  }
 0x2fd   :  { %1331 = vsyncadd [#allocation3], 4294967168 }
 0x2fe   :  { %1004 = vsyncpa [#allocation3], 1 }

</bundles_post_ra>
